<compile_context>
chip_gen: v6e
topology: v6e:2x2x1
jax: 0.10.0
libtpu: 0.0.40
codegen_flags: <defaults>
</compile_context>

<pallas_src>
import functools

import jax
import jax.numpy as jnp
from jax.experimental import pallas as pl
from jax.experimental.pallas import tpu as pltpu


def _largest_tile(n, candidates):
    """Largest candidate that divides n (and is <= n); falls back to n."""
    for c in candidates:
        if 0 < c <= n and n % c == 0:
            return c
    return n


def count_vectorizer_kernel(ids_ref, w_ref, b_ref, out_ref, acc_ref, *, tsub):
    k = pl.program_id(2)
    tb, seq_len = ids_ref.shape
    tv, te = w_ref.shape
    n_sub = tv // tsub                                             # static

    @pl.when(k == 0)
    def _():
        acc_ref[...] = jnp.zeros_like(acc_ref)

    ids = ids_ref[...]                                             # (tb, S) int32
    # Hoist the S id-column lane-broadcasts out of the sub-tile loop (XLU work;
    # only 2 XLU units on v6e/v7x).  Sentinel padding ids (== V) never match
    # any vocab lane, so no validity mask is needed.
    id_cols = [jnp.broadcast_to(ids[:, s:s + 1], (tb, tsub))
               for s in range(seq_len)]
    sub_iota = jax.lax.broadcasted_iota(jnp.int32, (tb, tsub), 1)

    # bf16 holds integer counts exactly up to 256 (8-bit mantissa); for very
    # long documents fall back to an f32 MXU pass for exactness.
    cnt_dtype = w_ref.dtype if seq_len <= 256 else jnp.float32

    for sub in range(n_sub):                                       # static sub-tile loop
        lane = (k * tv + sub * tsub) + sub_iota
        counts = jnp.zeros((tb, tsub), jnp.int32)
        for s in range(seq_len):                                   # S small & static
            counts = counts + (id_cols[s] == lane).astype(jnp.int32)
        w_sub = w_ref[pl.ds(sub * tsub, tsub), :]                  # static slice
        acc_ref[...] += jnp.dot(counts.astype(cnt_dtype),
                                w_sub.astype(cnt_dtype),
                                preferred_element_type=jnp.float32)

    @pl.when(k == pl.num_programs(2) - 1)
    def _():
        out_ref[...] = acc_ref[...] + b_ref[...]


def count_vectorizer_forward(token_ids, weight, bias, *,
                             max_tb=256, max_tv=1024, tsub=256,
                             acc_budget_bytes=8 << 20, weight_buffers=2):
    """token_ids: (B, S) int32, padded with sentinel id == V
       weight:    (V, E)  = fc.weight.T  (bf16 or f32)
       bias:      (1, E)  f32
       returns    (B, 1, E) f32
    """
    B, S = token_ids.shape
    V, E = weight.shape
    assert bias.shape == (1, E)

    # ---- batch tile: cover the whole padded batch so W streams from HBM once.
    tb = min(max_tb, ((B + 7) // 8) * 8)
    b_pad = ((B + tb - 1) // tb) * tb
    b_tiles = b_pad // tb
    if b_pad != B:
        pad_rows = jnp.full((b_pad - B, S), V, dtype=jnp.int32)    # sentinel rows
        token_ids = jnp.concatenate([token_ids, pad_rows], axis=0)

    # ---- V (reduction) tile: big, sub-tiled in-kernel to cap vreg pressure.
    tv_cands = tuple(c for c in (max_tv, 1024, 768, 512, 384, 256, 128) if c <= max_tv)
    tv = _largest_tile(V, tv_cands)
    tsub = _largest_tile(tv, tuple(c for c in (tsub, 256, 128) if c <= tsub))

    # ---- E tile: prefer te == E (single weight pass, counts built once per
    # (i, k)) when the (tb, E) f32 accumulator fits the budget; if the batch is
    # a single tile and E is large, split E in two parallel tiles so v7x's
    # second TensorCore has work (weight traffic stays constant).
    if E % 128 == 0 and tb * E * 4 <= acc_budget_bytes:
        te = E
        if b_tiles == 1 and E >= 512 and (E // 2) % 256 == 0:
            te = E // 2
    else:
        te = _largest_tile(E, (512, 256, 128))

    grid = (b_tiles, E // te, V // tv)

    # Weight stream spec; optionally deepen its pipeline if DMA is exposed.
    w_spec_kwargs = {}
    if weight_buffers > 2:
        w_spec_kwargs["pipeline_mode"] = pl.Buffered(weight_buffers)
    w_spec = pl.BlockSpec((tv, te), lambda i, j, k: (k, j), **w_spec_kwargs)

    # VMEM limit from the actual footprint (+ headroom), not a blanket 48 MiB.
    w_bytes = tv * te * weight.dtype.itemsize
    footprint = (2 * tb * S * 4                         # token ids (double-buffered)
                 + max(weight_buffers, 2) * w_bytes     # weight tiles
                 + 2 * te * 4                           # bias
                 + 2 * tb * te * 4                      # output
                 + tb * te * 4)                         # f32 accumulator scratch
    vmem_limit = min(int(footprint * 1.5) + (4 << 20), 56 << 20)

    # Cost hint: weight is re-streamed once per batch tile (b_tiles is 1 for
    # typical batches); counts compares repeat once per E tile.
    flops = 2 * b_pad * V * E + b_pad * S * V * (E // te)
    bytes_accessed = (b_tiles * V * E * weight.dtype.itemsize
                      + b_pad * S * 4 + b_pad * E * 4 + E * 4)

    kernel = functools.partial(count_vectorizer_kernel, tsub=tsub)
    out = pl.pallas_call(
        kernel,
        out_shape=jax.ShapeDtypeStruct((b_pad, E), jnp.float32),
        grid_spec=pltpu.PrefetchScalarGridSpec(
            num_scalar_prefetch=0,
            grid=grid,
            in_specs=[
                pl.BlockSpec((tb, S), lambda i, j, k: (i, 0)),     # token ids
                w_spec,                                            # weight tile
                pl.BlockSpec((1, te), lambda i, j, k: (0, j)),     # bias tile
            ],
            out_specs=pl.BlockSpec((tb, te), lambda i, j, k: (i, j)),
            scratch_shapes=[pltpu.VMEM((tb, te), jnp.float32)],
        ),
        compiler_params=pltpu.CompilerParams(
            dimension_semantics=("parallel", "parallel", "arbitrary"),
            vmem_limit_bytes=vmem_limit,
        ),
        cost_estimate=pl.CostEstimate(
            flops=flops, transcendentals=0, bytes_accessed=bytes_accessed),
    )(token_ids, weight, bias)

    return out[:B, None, :]                                        # unsqueeze(1)


# ----------------------- host-side glue (tokenization) -----------------------
# TODO(synk): Python string .split() and the word_to_idx dict lookup have no
# Pallas equivalent; tokenization runs on host and produces int32 token ids.
def build_vocab(texts):
    word_to_idx = {"<UNK>": 0}
    for t in texts:
        for w in t.split():
            if w not in word_to_idx:
                word_to_idx[w] = len(word_to_idx)
    return word_to_idx


def texts_to_ids(texts, word_to_idx, seq_len, vocab_size):
    unk = word_to_idx["<UNK>"]
    sentinel = vocab_size                      # one past vocab: matches no lane
    rows = []
    for t in texts:
        ids = [word_to_idx.get(w, unk) for w in t.split()][:seq_len]
        ids = ids + [sentinel] * (seq_len - len(ids))
        rows.append(ids)
    return jnp.asarray(rows, dtype=jnp.int32)


if __name__ == "__main__":
    # Small, module-consistent shapes.  V is chosen to exercise both the
    # V-reduction grid axis (V // tv == 2) and the in-kernel sub-tile loop.
    VOCAB_SIZE = 2048
    EMBED_DIM = 128
    SEQ_LEN = 8

    input_texts = [
        "the cat sat on the mat",
        "a dog barked at the cat loudly",
    ]
    B = len(input_texts)

    word_to_idx = build_vocab(input_texts)
    token_ids = texts_to_ids(input_texts, word_to_idx, SEQ_LEN, VOCAB_SIZE)  # (2, 8)

    # Deterministic fc parameters (LazyLinear -> Linear(VOCAB_SIZE, EMBED_DIM)).
    key = jax.random.PRNGKey(0)
    kw, kb = jax.random.split(key)
    weight_f32 = (jax.random.normal(kw, (VOCAB_SIZE, EMBED_DIM), jnp.float32)
                  * (1.0 / jnp.sqrt(VOCAB_SIZE)))       # stored as (V, E) = fc.weight.T
    weight_bf16 = weight_f32.astype(jnp.bfloat16)       # bf16 weight stream in HBM
    bias = jax.random.normal(kb, (1, EMBED_DIM), jnp.float32) * 0.01

    out = count_vectorizer_forward(token_ids, weight_bf16, bias)
    out = jax.block_until_ready(out)

    # Reference in plain JAX (same bf16 weights, f32 accumulation).
    vocab_iota = jnp.arange(VOCAB_SIZE, dtype=jnp.int32)
    counts_ref = (token_ids[:, :, None] == vocab_iota[None, None, :]) \
        .sum(axis=1).astype(jnp.float32)                            # (B, V)
    ref = jnp.einsum("bv,ve->be", counts_ref, weight_bf16.astype(jnp.float32),
                     precision=jax.lax.Precision.HIGHEST) + bias
    ref = ref[:, None, :]

    assert out.shape == (B, 1, EMBED_DIM), out.shape
    assert jnp.allclose(out, ref, atol=1e-4, rtol=1e-4), "mismatch vs reference"

    print("KERNEL_OK")
</pallas_src>

<mosaic_0001>
module attributes {stable_mosaic.version = 11 : i64} {
  func.func @count_vectorizer_kernel(%arg0: i32, %arg1: i32, %arg2: i32, %arg3: memref<8x8xi32, #tpu.memory_space<vmem>>, %arg4: memref<1024x128xbf16, #tpu.memory_space<vmem>>, %arg5: memref<1x128xf32, #tpu.memory_space<vmem>>, %arg6: memref<8x128xf32, #tpu.memory_space<vmem>>, %arg7: memref<8x128xf32, #tpu.memory_space<vmem>>) attributes {dimension_semantics = [#tpu.dimension_semantics<parallel>, #tpu.dimension_semantics<parallel>, #tpu.dimension_semantics<arbitrary>], iteration_bounds = array<i64: 1, 1, 2>, scalar_prefetch = 0 : i64, scratch_operands = 1 : i64, tpu.core_type = #tpu.core_type<tc>, window_params = [{transform_indices = @transform_0, window_bounds = array<i64: 8, 8>}, {transform_indices = @transform_1, window_bounds = array<i64: 1024, 128>}, {transform_indices = @transform_2, window_bounds = array<i64: 1, 128>}, {transform_indices = @transform_3, window_bounds = array<i64: 8, 128>}]} {
    %c0_i32 = arith.constant 0 : i32
    %0 = arith.cmpi eq, %arg2, %c0_i32 : i32
    %1 = arith.extui %0 : i1 to i32
    %c0_i32_0 = arith.constant 0 : i32
    %2 = arith.cmpi ne, %1, %c0_i32_0 : i32
    scf.if %2 {
      %cst_35 = arith.constant 0.000000e+00 : f32
      %172 = vector.broadcast %cst_35 : f32 to vector<8x128xf32>
      %c0_36 = arith.constant 0 : index
      %c0_37 = arith.constant 0 : index
      %173 = vector.load %arg7[%c0_36, %c0_37] : memref<8x128xf32, #tpu.memory_space<vmem>>, vector<8x128xf32>
      tpu.vector_store %arg7[%c0_36, %c0_37], %172 {strides = array<i32>} : memref<8x128xf32, #tpu.memory_space<vmem>>, vector<8x128xf32>,
    } else {
    }
    %c0 = arith.constant 0 : index
    %c0_1 = arith.constant 0 : index
    %3 = vector.load %arg3[%c0, %c0_1] : memref<8x8xi32, #tpu.memory_space<vmem>>, vector<8x8xi32>
    %4 = vector.extract_strided_slice %3 {offsets = [0, 0], sizes = [8, 1], strides = [1, 1]} : vector<8x8xi32> to vector<8x1xi32>
    %5 = vector.shape_cast %4 : vector<8x1xi32> to vector<8x1xi32>
    %6 = vector.broadcast %5 : vector<8x1xi32> to vector<8x256xi32>
    %7 = vector.extract_strided_slice %3 {offsets = [0, 1], sizes = [8, 1], strides = [1, 1]} : vector<8x8xi32> to vector<8x1xi32>
    %8 = vector.shape_cast %7 : vector<8x1xi32> to vector<8x1xi32>
    %9 = vector.broadcast %8 : vector<8x1xi32> to vector<8x256xi32>
    %10 = vector.extract_strided_slice %3 {offsets = [0, 2], sizes = [8, 1], strides = [1, 1]} : vector<8x8xi32> to vector<8x1xi32>
    %11 = vector.shape_cast %10 : vector<8x1xi32> to vector<8x1xi32>
    %12 = vector.broadcast %11 : vector<8x1xi32> to vector<8x256xi32>
    %13 = vector.extract_strided_slice %3 {offsets = [0, 3], sizes = [8, 1], strides = [1, 1]} : vector<8x8xi32> to vector<8x1xi32>
    %14 = vector.shape_cast %13 : vector<8x1xi32> to vector<8x1xi32>
    %15 = vector.broadcast %14 : vector<8x1xi32> to vector<8x256xi32>
    %16 = vector.extract_strided_slice %3 {offsets = [0, 4], sizes = [8, 1], strides = [1, 1]} : vector<8x8xi32> to vector<8x1xi32>
    %17 = vector.shape_cast %16 : vector<8x1xi32> to vector<8x1xi32>
    %18 = vector.broadcast %17 : vector<8x1xi32> to vector<8x256xi32>
    %19 = vector.extract_strided_slice %3 {offsets = [0, 5], sizes = [8, 1], strides = [1, 1]} : vector<8x8xi32> to vector<8x1xi32>
    %20 = vector.shape_cast %19 : vector<8x1xi32> to vector<8x1xi32>
    %21 = vector.broadcast %20 : vector<8x1xi32> to vector<8x256xi32>
    %22 = vector.extract_strided_slice %3 {offsets = [0, 6], sizes = [8, 1], strides = [1, 1]} : vector<8x8xi32> to vector<8x1xi32>
    %23 = vector.shape_cast %22 : vector<8x1xi32> to vector<8x1xi32>
    %24 = vector.broadcast %23 : vector<8x1xi32> to vector<8x256xi32>
    %25 = vector.extract_strided_slice %3 {offsets = [0, 7], sizes = [8, 1], strides = [1, 1]} : vector<8x8xi32> to vector<8x1xi32>
    %26 = vector.shape_cast %25 : vector<8x1xi32> to vector<8x1xi32>
    %27 = vector.broadcast %26 : vector<8x1xi32> to vector<8x256xi32>
    %28 = tpu.iota {dimensions = array<i32: 1>} : vector<8x256xi32>
    %c1024_i32 = arith.constant 1024 : i32
    %29 = arith.muli %arg2, %c1024_i32 : i32
    %c0_i32_2 = arith.constant 0 : i32
    %30 = arith.addi %29, %c0_i32_2 : i32
    %31 = vector.broadcast %30 : i32 to vector<8x256xi32>
    %32 = arith.addi %31, %28 : vector<8x256xi32>
    %c0_i32_3 = arith.constant 0 : i32
    %33 = vector.broadcast %c0_i32_3 : i32 to vector<8x256xi32>
    %34 = arith.cmpi eq, %6, %32 : vector<8x256xi32>
    %35 = arith.extui %34 : vector<8x256xi1> to vector<8x256xi32>
    %36 = arith.addi %33, %35 : vector<8x256xi32>
    %37 = arith.cmpi eq, %9, %32 : vector<8x256xi32>
    %38 = arith.extui %37 : vector<8x256xi1> to vector<8x256xi32>
    %39 = arith.addi %36, %38 : vector<8x256xi32>
    %40 = arith.cmpi eq, %12, %32 : vector<8x256xi32>
    %41 = arith.extui %40 : vector<8x256xi1> to vector<8x256xi32>
    %42 = arith.addi %39, %41 : vector<8x256xi32>
    %43 = arith.cmpi eq, %15, %32 : vector<8x256xi32>
    %44 = arith.extui %43 : vector<8x256xi1> to vector<8x256xi32>
    %45 = arith.addi %42, %44 : vector<8x256xi32>
    %46 = arith.cmpi eq, %18, %32 : vector<8x256xi32>
    %47 = arith.extui %46 : vector<8x256xi1> to vector<8x256xi32>
    %48 = arith.addi %45, %47 : vector<8x256xi32>
    %49 = arith.cmpi eq, %21, %32 : vector<8x256xi32>
    %50 = arith.extui %49 : vector<8x256xi1> to vector<8x256xi32>
    %51 = arith.addi %48, %50 : vector<8x256xi32>
    %52 = arith.cmpi eq, %24, %32 : vector<8x256xi32>
    %53 = arith.extui %52 : vector<8x256xi1> to vector<8x256xi32>
    %54 = arith.addi %51, %53 : vector<8x256xi32>
    %55 = arith.cmpi eq, %27, %32 : vector<8x256xi32>
    %56 = arith.extui %55 : vector<8x256xi1> to vector<8x256xi32>
    %57 = arith.addi %54, %56 : vector<8x256xi32>
    %c0_4 = arith.constant 0 : index
    %c0_5 = arith.constant 0 : index
    %58 = vector.load %arg4[%c0_4, %c0_5] : memref<1024x128xbf16, #tpu.memory_space<vmem>>, vector<256x128xbf16>
    %c0_6 = arith.constant 0 : index
    %c0_7 = arith.constant 0 : index
    %59 = vector.load %arg7[%c0_6, %c0_7] : memref<8x128xf32, #tpu.memory_space<vmem>>, vector<8x128xf32>
    %60 = arith.sitofp %57 : vector<8x256xi32> to vector<8x256xbf16>
    %cst = arith.constant dense<0.000000e+00> : vector<8x128xf32>
    %61 = tpu.matmul %60, %58, %cst {dimension_numbers = #tpu.dot_dimension_numbers<[1], [0], [0], [1], [0, 0, 1, 1], [], []>} : vector<8x256xbf16>, vector<256x128xbf16>, vector<8x128xf32> -> vector<8x128xf32>
    %62 = arith.addf %59, %61 : vector<8x128xf32>
    %c0_8 = arith.constant 0 : index
    %c0_9 = arith.constant 0 : index
    %63 = vector.load %arg7[%c0_8, %c0_9] : memref<8x128xf32, #tpu.memory_space<vmem>>, vector<8x128xf32>
    tpu.vector_store %arg7[%c0_8, %c0_9], %62 {strides = array<i32>} : memref<8x128xf32, #tpu.memory_space<vmem>>, vector<8x128xf32>,
    %c1024_i32_10 = arith.constant 1024 : i32
    %64 = arith.muli %arg2, %c1024_i32_10 : i32
    %c256_i32 = arith.constant 256 : i32
    %65 = arith.addi %64, %c256_i32 : i32
    %66 = vector.broadcast %65 : i32 to vector<8x256xi32>
    %67 = arith.addi %66, %28 : vector<8x256xi32>
    %c0_i32_11 = arith.constant 0 : i32
    %68 = vector.broadcast %c0_i32_11 : i32 to vector<8x256xi32>
    %69 = arith.cmpi eq, %6, %67 : vector<8x256xi32>
    %70 = arith.extui %69 : vector<8x256xi1> to vector<8x256xi32>
    %71 = arith.addi %68, %70 : vector<8x256xi32>
    %72 = arith.cmpi eq, %9, %67 : vector<8x256xi32>
    %73 = arith.extui %72 : vector<8x256xi1> to vector<8x256xi32>
    %74 = arith.addi %71, %73 : vector<8x256xi32>
    %75 = arith.cmpi eq, %12, %67 : vector<8x256xi32>
    %76 = arith.extui %75 : vector<8x256xi1> to vector<8x256xi32>
    %77 = arith.addi %74, %76 : vector<8x256xi32>
    %78 = arith.cmpi eq, %15, %67 : vector<8x256xi32>
    %79 = arith.extui %78 : vector<8x256xi1> to vector<8x256xi32>
    %80 = arith.addi %77, %79 : vector<8x256xi32>
    %81 = arith.cmpi eq, %18, %67 : vector<8x256xi32>
    %82 = arith.extui %81 : vector<8x256xi1> to vector<8x256xi32>
    %83 = arith.addi %80, %82 : vector<8x256xi32>
    %84 = arith.cmpi eq, %21, %67 : vector<8x256xi32>
    %85 = arith.extui %84 : vector<8x256xi1> to vector<8x256xi32>
    %86 = arith.addi %83, %85 : vector<8x256xi32>
    %87 = arith.cmpi eq, %24, %67 : vector<8x256xi32>
    %88 = arith.extui %87 : vector<8x256xi1> to vector<8x256xi32>
    %89 = arith.addi %86, %88 : vector<8x256xi32>
    %90 = arith.cmpi eq, %27, %67 : vector<8x256xi32>
    %91 = arith.extui %90 : vector<8x256xi1> to vector<8x256xi32>
    %92 = arith.addi %89, %91 : vector<8x256xi32>
    %c256 = arith.constant 256 : index
    %c0_12 = arith.constant 0 : index
    %93 = vector.load %arg4[%c256, %c0_12] : memref<1024x128xbf16, #tpu.memory_space<vmem>>, vector<256x128xbf16>
    %c0_13 = arith.constant 0 : index
    %c0_14 = arith.constant 0 : index
    %94 = vector.load %arg7[%c0_13, %c0_14] : memref<8x128xf32, #tpu.memory_space<vmem>>, vector<8x128xf32>
    %95 = arith.sitofp %92 : vector<8x256xi32> to vector<8x256xbf16>
    %cst_15 = arith.constant dense<0.000000e+00> : vector<8x128xf32>
    %96 = tpu.matmul %95, %93, %cst_15 {dimension_numbers = #tpu.dot_dimension_numbers<[1], [0], [0], [1], [0, 0, 1, 1], [], []>} : vector<8x256xbf16>, vector<256x128xbf16>, vector<8x128xf32> -> vector<8x128xf32>
    %97 = arith.addf %94, %96 : vector<8x128xf32>
    %c0_16 = arith.constant 0 : index
    %c0_17 = arith.constant 0 : index
    %98 = vector.load %arg7[%c0_16, %c0_17] : memref<8x128xf32, #tpu.memory_space<vmem>>, vector<8x128xf32>
    tpu.vector_store %arg7[%c0_16, %c0_17], %97 {strides = array<i32>} : memref<8x128xf32, #tpu.memory_space<vmem>>, vector<8x128xf32>,
    %c1024_i32_18 = arith.constant 1024 : i32
    %99 = arith.muli %arg2, %c1024_i32_18 : i32
    %c512_i32 = arith.constant 512 : i32
    %100 = arith.addi %99, %c512_i32 : i32
    %101 = vector.broadcast %100 : i32 to vector<8x256xi32>
    %102 = arith.addi %101, %28 : vector<8x256xi32>
    %c0_i32_19 = arith.constant 0 : i32
    %103 = vector.broadcast %c0_i32_19 : i32 to vector<8x256xi32>
    %104 = arith.cmpi eq, %6, %102 : vector<8x256xi32>
    %105 = arith.extui %104 : vector<8x256xi1> to vector<8x256xi32>
    %106 = arith.addi %103, %105 : vector<8x256xi32>
    %107 = arith.cmpi eq, %9, %102 : vector<8x256xi32>
    %108 = arith.extui %107 : vector<8x256xi1> to vector<8x256xi32>
    %109 = arith.addi %106, %108 : vector<8x256xi32>
    %110 = arith.cmpi eq, %12, %102 : vector<8x256xi32>
    %111 = arith.extui %110 : vector<8x256xi1> to vector<8x256xi32>
    %112 = arith.addi %109, %111 : vector<8x256xi32>
    %113 = arith.cmpi eq, %15, %102 : vector<8x256xi32>
    %114 = arith.extui %113 : vector<8x256xi1> to vector<8x256xi32>
    %115 = arith.addi %112, %114 : vector<8x256xi32>
    %116 = arith.cmpi eq, %18, %102 : vector<8x256xi32>
    %117 = arith.extui %116 : vector<8x256xi1> to vector<8x256xi32>
    %118 = arith.addi %115, %117 : vector<8x256xi32>
    %119 = arith.cmpi eq, %21, %102 : vector<8x256xi32>
    %120 = arith.extui %119 : vector<8x256xi1> to vector<8x256xi32>
    %121 = arith.addi %118, %120 : vector<8x256xi32>
    %122 = arith.cmpi eq, %24, %102 : vector<8x256xi32>
    %123 = arith.extui %122 : vector<8x256xi1> to vector<8x256xi32>
    %124 = arith.addi %121, %123 : vector<8x256xi32>
    %125 = arith.cmpi eq, %27, %102 : vector<8x256xi32>
    %126 = arith.extui %125 : vector<8x256xi1> to vector<8x256xi32>
    %127 = arith.addi %124, %126 : vector<8x256xi32>
    %c512 = arith.constant 512 : index
    %c0_20 = arith.constant 0 : index
    %128 = vector.load %arg4[%c512, %c0_20] : memref<1024x128xbf16, #tpu.memory_space<vmem>>, vector<256x128xbf16>
    %c0_21 = arith.constant 0 : index
    %c0_22 = arith.constant 0 : index
    %129 = vector.load %arg7[%c0_21, %c0_22] : memref<8x128xf32, #tpu.memory_space<vmem>>, vector<8x128xf32>
    %130 = arith.sitofp %127 : vector<8x256xi32> to vector<8x256xbf16>
    %cst_23 = arith.constant dense<0.000000e+00> : vector<8x128xf32>
    %131 = tpu.matmul %130, %128, %cst_23 {dimension_numbers = #tpu.dot_dimension_numbers<[1], [0], [0], [1], [0, 0, 1, 1], [], []>} : vector<8x256xbf16>, vector<256x128xbf16>, vector<8x128xf32> -> vector<8x128xf32>
    %132 = arith.addf %129, %131 : vector<8x128xf32>
    %c0_24 = arith.constant 0 : index
    %c0_25 = arith.constant 0 : index
    %133 = vector.load %arg7[%c0_24, %c0_25] : memref<8x128xf32, #tpu.memory_space<vmem>>, vector<8x128xf32>
    tpu.vector_store %arg7[%c0_24, %c0_25], %132 {strides = array<i32>} : memref<8x128xf32, #tpu.memory_space<vmem>>, vector<8x128xf32>,
    %c1024_i32_26 = arith.constant 1024 : i32
    %134 = arith.muli %arg2, %c1024_i32_26 : i32
    %c768_i32 = arith.constant 768 : i32
    %135 = arith.addi %134, %c768_i32 : i32
    %136 = vector.broadcast %135 : i32 to vector<8x256xi32>
    %137 = arith.addi %136, %28 : vector<8x256xi32>
    %c0_i32_27 = arith.constant 0 : i32
    %138 = vector.broadcast %c0_i32_27 : i32 to vector<8x256xi32>
    %139 = arith.cmpi eq, %6, %137 : vector<8x256xi32>
    %140 = arith.extui %139 : vector<8x256xi1> to vector<8x256xi32>
    %141 = arith.addi %138, %140 : vector<8x256xi32>
    %142 = arith.cmpi eq, %9, %137 : vector<8x256xi32>
    %143 = arith.extui %142 : vector<8x256xi1> to vector<8x256xi32>
    %144 = arith.addi %141, %143 : vector<8x256xi32>
    %145 = arith.cmpi eq, %12, %137 : vector<8x256xi32>
    %146 = arith.extui %145 : vector<8x256xi1> to vector<8x256xi32>
    %147 = arith.addi %144, %146 : vector<8x256xi32>
    %148 = arith.cmpi eq, %15, %137 : vector<8x256xi32>
    %149 = arith.extui %148 : vector<8x256xi1> to vector<8x256xi32>
    %150 = arith.addi %147, %149 : vector<8x256xi32>
    %151 = arith.cmpi eq, %18, %137 : vector<8x256xi32>
    %152 = arith.extui %151 : vector<8x256xi1> to vector<8x256xi32>
    %153 = arith.addi %150, %152 : vector<8x256xi32>
    %154 = arith.cmpi eq, %21, %137 : vector<8x256xi32>
    %155 = arith.extui %154 : vector<8x256xi1> to vector<8x256xi32>
    %156 = arith.addi %153, %155 : vector<8x256xi32>
    %157 = arith.cmpi eq, %24, %137 : vector<8x256xi32>
    %158 = arith.extui %157 : vector<8x256xi1> to vector<8x256xi32>
    %159 = arith.addi %156, %158 : vector<8x256xi32>
    %160 = arith.cmpi eq, %27, %137 : vector<8x256xi32>
    %161 = arith.extui %160 : vector<8x256xi1> to vector<8x256xi32>
    %162 = arith.addi %159, %161 : vector<8x256xi32>
    %c768 = arith.constant 768 : index
    %c0_28 = arith.constant 0 : index
    %163 = vector.load %arg4[%c768, %c0_28] : memref<1024x128xbf16, #tpu.memory_space<vmem>>, vector<256x128xbf16>
    %c0_29 = arith.constant 0 : index
    %c0_30 = arith.constant 0 : index
    %164 = vector.load %arg7[%c0_29, %c0_30] : memref<8x128xf32, #tpu.memory_space<vmem>>, vector<8x128xf32>
    %165 = arith.sitofp %162 : vector<8x256xi32> to vector<8x256xbf16>
    %cst_31 = arith.constant dense<0.000000e+00> : vector<8x128xf32>
    %166 = tpu.matmul %165, %163, %cst_31 {dimension_numbers = #tpu.dot_dimension_numbers<[1], [0], [0], [1], [0, 0, 1, 1], [], []>} : vector<8x256xbf16>, vector<256x128xbf16>, vector<8x128xf32> -> vector<8x128xf32>
    %167 = arith.addf %164, %166 : vector<8x128xf32>
    %c0_32 = arith.constant 0 : index
    %c0_33 = arith.constant 0 : index
    %168 = vector.load %arg7[%c0_32, %c0_33] : memref<8x128xf32, #tpu.memory_space<vmem>>, vector<8x128xf32>
    tpu.vector_store %arg7[%c0_32, %c0_33], %167 {strides = array<i32>} : memref<8x128xf32, #tpu.memory_space<vmem>>, vector<8x128xf32>,
    %c1_i32 = arith.constant 1 : i32
    %169 = arith.cmpi eq, %arg2, %c1_i32 : i32
    %170 = arith.extui %169 : i1 to i32
    %c0_i32_34 = arith.constant 0 : i32
    %171 = arith.cmpi ne, %170, %c0_i32_34 : i32
    scf.if %171 {
      %c0_35 = arith.constant 0 : index
      %c0_36 = arith.constant 0 : index
      %172 = vector.load %arg7[%c0_35, %c0_36] : memref<8x128xf32, #tpu.memory_space<vmem>>, vector<8x128xf32>
      %c0_37 = arith.constant 0 : index
      %c0_38 = arith.constant 0 : index
      %173 = vector.load %arg5[%c0_37, %c0_38] : memref<1x128xf32, #tpu.memory_space<vmem>>, vector<1x128xf32>
      %174 = vector.broadcast %173 : vector<1x128xf32> to vector<8x128xf32>
      %175 = arith.addf %172, %174 : vector<8x128xf32>
      %c0_39 = arith.constant 0 : index
      %c0_40 = arith.constant 0 : index
      %176 = vector.load %arg6[%c0_39, %c0_40] : memref<8x128xf32, #tpu.memory_space<vmem>>, vector<8x128xf32>
      tpu.vector_store %arg6[%c0_39, %c0_40], %175 {strides = array<i32>} : memref<8x128xf32, #tpu.memory_space<vmem>>, vector<8x128xf32>,
    } else {
    }
    return
  }
  func.func @transform_0(%arg0: i32, %arg1: i32, %arg2: i32) -> (i32, i32) {
    %c0_i32 = arith.constant 0 : i32
    %c0_i32_0 = arith.constant 0 : i32
    return %arg0, %c0_i32 : i32, i32
  }
  func.func @transform_1(%arg0: i32, %arg1: i32, %arg2: i32) -> (i32, i32) {
    %c0_i32 = arith.constant 0 : i32
    return %arg2, %arg1 : i32, i32
  }
  func.func @transform_2(%arg0: i32, %arg1: i32, %arg2: i32) -> (i32, i32) {
    %c0_i32 = arith.constant 0 : i32
    %c0_i32_0 = arith.constant 0 : i32
    return %c0_i32, %arg1 : i32, i32
  }
  func.func @transform_3(%arg0: i32, %arg1: i32, %arg2: i32) -> (i32, i32) {
    %c0_i32 = arith.constant 0 : i32
    return %arg0, %arg1 : i32, i32
  }
}

</mosaic_0001>

<bundles_post_ra>
// kernel: tpu_custom_call.1
= control target key start
LH: loop header
LB: loop body
LE: loop exit
PB: predicated region body
PF: predicated region fallthrough
CT: control target
= control target key end

     0   :  { %8 = vsyncpa [#allocation4], 0  ;;  %s2273_s0 = inlined_call_operand.hbm [shape: s32[8,8], index: 0, kind: input, shape index: {}]   ;;  %s2274_s1 = inlined_call_operand.hbm [shape: bf16[2048,128], index: 1, kind: input, shape index: {}]   ;;  %s2275_s2 = inlined_call_operand.vmem [shape: f32[1,128], index: 2, kind: input, shape index: {}]   ;;  %s2276_s3 = inlined_call_operand.hbm [shape: f32[8,128], index: 3, kind: output, shape index: {}]  }
   0x1   :  { %9 = vsyncpa [#allocation7], 0 }
   0x2   :  { %11 = vsyncpa [#allocation7 + $0x1], 0 }
   0x3   :  { %12 = vsyncpa [#allocation5], 0  ;;  %s1793_s12 = smov 0   ;;  %s1795_s13 = smov 0  }
   0x4   :  { %s1797_s14 = smov 0   ;;  %s1799_s15 = smov 0  }
   0x5   :  { %s1801_s16 = smov 0   ;;  %s1803_s17 = smov 0  }
   0x6 LB: > { %s1292_s18 = sadd.s32 4294967295, %s1757_s17   ;;  %s72_s19 = sadd.s32 1, %s1745_s14  ;;  %s1757_s17 = sphi %s1803_s17, %s18_s17   ;;  %s1753_s16 = sphi %s1801_s16, %s2291_s16   ;;  %s1749_s15 = sphi %s1799_s15, %s2290_s15   ;;  %s1745_s14 = sphi %s1797_s14, %s2289_s14   ;;  %s1741_s13 = sphi %s1795_s13, %s2288_s13   ;;  %s1737_s12 = sphi %s1793_s12, %s2287_s12  }
   0x7   : > { %p79_p0 = scmp.ne.s32.totalorder %s1745_s14, %s1741_s13  ;;  %p80_p1 = scmp.eq.s32.totalorder %s1757_s17, 0 }
   0x8   : > { %p85_p2 = scmp.ne.s32.totalorder %s1741_s13, %s1737_s12  ;;  %p1829_p3 = scmp.eq.s32.totalorder %s1292_s18, 0 }
   0x9   : > { %p81_p4 = por %p80_p1, %p79_p0  ;;  %p1293_p5 = scmp.ge.s32.totalorder %s1757_s17, 1 }
   0xa   : > { %p1836_p6 = por %p1829_p3, %p85_p2  ;;  %p150_p7 = scmp.lt.s32.totalorder %s1757_s17, 3 }
   0xb   : > { %s1759_s23 = smov [#allocation3]   ;;  %p1483_p10 = scmp.lt.s32.totalorder %s1757_s17, 2 }
   0xc   : > { %s2280_s21 = scalar_select %p1836_p6, 1, 0 }
   0xd   : > { %p1841_p8 = pnand %p1293_p5, %p150_p7  ;;  %s165_s24 = sshll.u32 %s1759_s23, 4  ;;  %s166_s24 = int_to_ptr.vmem [resolvable:$true] %s165_s24 }
   0xe   : > { %s182_s25 = sand.u32 1, %s1745_s14   ;;  %p1851_p12 = pnand %p1483_p10, %p81_p4 }
   0xf   : > { %s2281_s22 = scalar_select %p1841_p8, 1, 0 }
  0x10   : > { %p1474_p9 = pneg %p1841_p8  ;;  %s1632_s27 = scalar_lea.vmem %s166_s24, 128 }
  0x11   : > { %p1633_p0 = scmp.ne.s32.totalorder %s166_s24, %s1632_s27  ;;  %p1640_p5 = scmp.lt.s32.totalorder %s166_s24, %s166_s24 }
  0x12   : > { %p1475_p11 = pnand %p1474_p9, %p1829_p3  ;;  %p1641_p7 = scmp.lt.s32.totalorder %s1632_s27, %s1632_s27 }
  0x14   : > { %p1623_p13 = pneg %p1475_p11  ;;  %p1642_p6 = por %p1641_p7, %p1640_p5 }
  0x16   : > { %p1635_p1 = pnand %p1633_p0, %p1623_p13 }
  0x18   : > { %p1636_p2 = pneg %p1635_p1 }
  0x1a   : > { %p1643_p8 = pnand %p1642_p6, %p1636_p2 }
  0x1c   : > { %1646 = shalt.err (!%p1643_p8)
}
  0x1d   : > { %1477 = dma.hbm_to_vmem [thread:$0]  (!%p1475_p11), %s2273_s0, 128, %s166_s24, [#allocation4]  }
  0x1e   : > { %s30_s30 = sadd.s32 1, %s1753_s16  ;;  %s1297_s4 = sshll.u32 %s182_s25, 9 }
  0x1f   : > { %p31_p4 = scmp.ge.s32.totalorder %s30_s30, 2  ;;  %s1375_s5 = sshll.u32 %s1753_s16, 13 }
  0x20   : > { %s186_s6 = scalar_lea.vmem [#allocation6], %s1297_s4  ;;  %s193_s10 = scalar_lea.hbm %s2274_s1, %s1375_s5 }
  0x21   : > { %s194_s7 = sshll.u32 %s186_s6, 4  ;;  %s2293_s30 = smov (%p31_p4, %s30_s30), 0  ;;  %s195_s7 = int_to_ptr.vmem [resolvable:$true] %s194_s7 }
  0x22   : > { %s67_s11 = ssub.s32 %s1753_s16, %s2293_s30  ;;  %s183_s23 = scalar_lea.sflag [#allocation7], %s182_s25 }
  0x23   : > { %p1867_p6 = scmp.eq.s32.totalorder %s67_s11, 0  ;;  %p1649_p8 = pneg %p1851_p12 }
  0x24   : > { %s1660_s24 = scalar_lea.vmem %s195_s7, 8192  ;;  %s1760_s27 = smov [#allocation6]  }
  0x25   : > { %p1661_p9 = scmp.ne.s32.totalorder %s195_s7, %s1660_s24  ;;  %s1665_s28 = sshll.u32 %s1760_s27, 4  ;;  %s1666_s28 = int_to_ptr.vmem [resolvable:$false] %s1665_s28 }
  0x26   : > { %s1667_s29 = scalar_lea.vmem %s1666_s28, 16384  ;;  %p1668_p13 = scmp.lt.s32.totalorder %s195_s7, %s1666_s28 }
  0x27   : > { %p1663_p10 = pnand %p1661_p9, %p1649_p8  ;;  %p1669_p0 = scmp.lt.s32.totalorder %s1667_s29, %s1660_s24 }
  0x29   : > { %p1664_p11 = pneg %p1663_p10  ;;  %p1670_p1 = por %p1669_p0, %p1668_p13 }
  0x2b   : > { %p1671_p2 = pnand %p1670_p1, %p1664_p11 }
  0x2d   : > { %1674 = shalt.err (!%p1671_p2)
}
  0x2e   : > { %s1761_s4 = smov 64   ;;  %s1762_s25 = smov 4  }
  0x2f   : > { %1481 = dma.hbm_to_vmem [thread:$0]  (!%p1851_p12), %s193_s10, 8192, %s195_s7, %s183_s23, %s1761_s4, %s1761_s4, %s1762_s25  }
  0x30   : > { %s1880_s5 = scalar_select %p1867_p6, %s1745_s14, %s72_s19  }
  0x31   : > { %p2284_p5 = scmp.ne.s32.totalorder %s2281_s22, 0 }
  0x33   : > { %206 = sbr.rel (%p2284_p5) target bundleno = 489 (0x1e9), region = 32 }
  0x38   : > { %1724 = dma.done.wait (%p1829_p3), [#allocation4], 128  }
  0x39   : > { %1726 = vsyncadd (%p1829_p3), [#allocation4], 4294967168  ;;  %s212_s6 = sand.u32 1, %s1741_s13   ;;  %p2285_p12 = scmp.ne.s32.totalorder %s2280_s21, 0 }
  0x3a   : > { %s1302_s8 = sshll.u32 %s212_s6, 9  ;;  %s213_s9 = scalar_lea.sflag [#allocation7], %s212_s6 }
  0x3b   : > { %s1889_s26 = scalar_lea.vmem [#allocation6], %s1302_s8 }
  0x3c   : > { %1728 = dma.done.wait (%p2285_p12), %s213_s9, 8192  }
  0x3d   : > { %1730 = vsyncadd (%p2285_p12), %s213_s9, 4294959104  ;;  %p1303_p7 = scmp.ne.s32.totalorder %s1749_s15, 0 }
  0x3f   : > { %245 = sbr.rel (%p1303_p7) target bundleno = 70 (0x46), region = 44 }
  0x44   : > { %v1763_v0 = vmov 0.0  }
  0x45   : > { %246 = vst [vmem:[#allocation2] sm:$0xff] %v1763_v0 }
  0x46 PF: > { %v247_v1 = vld [vmem:[#allocation3] sm:$0xff]  ;;  %v1764_v3 = vmov 2   ;;  %v1765_v4 = vmov 0   ;;  %v1561_v8 = vld [vmem:[%s1889_s26 + $0x70] sm:$0xff]   ;;  %v1766_v9 = vmov 3   ;;  %v1767_v10 = vmov 1  }
  0x47   : > { %v1557_v2 = vld [vmem:[%s1889_s26 + $0x78] sm:$0xff]   ;;  %1550 = vset.pattern.permute.xlu1 %v1764_v3  ;;  %1548 = vset.pattern.permute.xlu0 %v1765_v4  ;;  %v1562_v11 = vld [vmem:[%s1889_s26 + $0xf0] sm:$0xff]   ;;  %v1565_v14 = vld [vmem:[%s1889_s26 + $0x68] sm:$0xff]   ;;  %v1768_v15 = vmov 4   ;;  %v1769_v16 = vmov 5   ;;  %v1770_v22 = vmov 6   ;;  %v272_v44 = vlaneseq }
  0x48   : > { %255 = vperm.xlu1 %1550, %v247_v1   ;;  %249 = vperm.xlu0 %1548, %v247_v1   ;;  %v1558_v5 = vld [vmem:[%s1889_s26 + $0xf8] sm:$0xff]   ;;  %v1563_v12 = vld [vmem:[%s1889_s26 + $0x30] sm:$0xff]   ;;  %v1566_v17 = vld [vmem:[%s1889_s26 + $0xe8] sm:$0xff]   ;;  %v1771_v24 = vmov 7   ;;  %s1304_s19 = sshll.u32 %s1749_s15, 10  ;;  %p1369_p3 = scmp.ne.s32.totalorder %s1749_s15, 1 }
  0x49   : > { %1376 = vmatprep.subr.bf16.mxu0 %v1557_v2  ;;  %v1559_v6 = vld [vmem:[%s1889_s26 + $0x38] sm:$0xff]   ;;  %1398 = vmatprep.subr.bf16.mxu1 %v1558_v5  ;;  %v1564_v13 = vld [vmem:[%s1889_s26 + $0xb0] sm:$0xff]   ;;  %v1567_v18 = vld [vmem:[%s1889_s26 + $0x28] sm:$0xff]   ;;  %v273_v45 = vand.u32 127, %v272_v44  ;;  %s500_s20 = sadd.s32 256, %s1304_s19  ;;  %s725_s21 = sadd.s32 512, %s1304_s19  ;;  %v276_v47 = vstv %s1304_s19 }
  0x4a   : > { %v1560_v7 = vld [vmem:[%s1889_s26 + $0xb8] sm:$0xff]   ;;  %1377 = vmatpush3.bf16.msra.mxu0 %v1559_v6  ;;  %v1568_v19 = vld [vmem:[%s1889_s26 + $0xa8] sm:$0xff]   ;;  %v1569_v20 = vld [vmem:[%s1889_s26 + $0x60] sm:$0xff]   ;;  %v501_v48 = vstv %s500_s20  ;;  %s950_s22 = sadd.s32 768, %s1304_s19 }
  0x4b   : > { %1399 = vmatpush3.bf16.msra.mxu1 %v1560_v7  ;;  %1378 = vmatprep.subr.bf16.mxu0 %v1561_v8  ;;  %v1570_v21 = vld [vmem:[%s1889_s26 + $0xe0] sm:$0xff]   ;;  %v1573_v26 = vld [vmem:[%s1889_s26 + $0x58] sm:$0xff]   ;;  %v1577_v30 = vld [vmem:[%s1889_s26 + $0x50] sm:$0xff]   ;;  %v274_v46 = vadd.s32 128, %v273_v45  ;;  %v726_v49 = vstv %s725_s21  ;;  %v1942_v56 = vadd.s32 %v276_v47, %v273_v45  ;;  %v1952_v58 = vadd.s32 %v501_v48, %v273_v45 }
  0x4c   : > { %1551 = vset.pattern.permute.xlu1 %v1766_v9  ;;  %1549 = vset.pattern.permute.xlu0 %v1767_v10  ;;  %v1571_v23 = vld [vmem:[%s1889_s26 + $0x20] sm:$0xff]   ;;  %v1574_v27 = vld [vmem:[%s1889_s26 + $0xd8] sm:$0xff]   ;;  %v1578_v31 = vld [vmem:[%s1889_s26 + $0xd0] sm:$0xff]   ;;  %v1936_v52 = vadd.s32 %v726_v49, %v273_v45  ;;  %v951_v53 = vstv %s950_s22 }
  0x4d   : > { %258 = vperm.xlu1 %1551, %v247_v1   ;;  %252 = vperm.xlu0 %1549, %v247_v1   ;;  %v1572_v25 = vld [vmem:[%s1889_s26 + $0xa0] sm:$0xff]   ;;  %v1575_v28 = vld [vmem:[%s1889_s26 + $0x18] sm:$0xff]   ;;  %v1579_v32 = vld [vmem:[%s1889_s26 + $0x10] sm:$0xff]   ;;  %v1932_v50 = vadd.s32 %v276_v47, %v274_v46  ;;  %v1934_v51 = vadd.s32 %v501_v48, %v274_v46  ;;  %v1950_v57 = vadd.s32 %v951_v53, %v273_v45 }
  0x4e   : > { %1400 = vmatprep.subr.bf16.mxu1 %v1562_v11  ;;  %1379 = vmatpush3.bf16.msra.mxu0 %v1563_v12  ;;  %v1576_v29 = vld [vmem:[%s1889_s26 + $0x98] sm:$0xff]   ;;  %v1580_v33 = vld [vmem:[%s1889_s26 + $0x90] sm:$0xff]   ;;  %v1581_v34 = vld [vmem:[%s1889_s26 + $0x48] sm:$0xff]   ;;  %v1962_v59 = vadd.s32 %v726_v49, %v274_v46  ;;  %v1964_v60 = vadd.s32 %v951_v53, %v274_v46 }
  0x4f   : > { %1401 = vmatpush3.bf16.msra.mxu1 %v1564_v13  ;;  %1380 = vmatprep.subr.bf16.mxu0 %v1565_v14  ;;  %v1582_v35 = vld [vmem:[%s1889_s26 + $0xc8] sm:$0xff]   ;;  %v1585_v38 = vld [vmem:[%s1889_s26 + $0x40] sm:$0xff]   ;;  %v1589_v42 = vld [vmem:[%s1889_s26 + $0x178] sm:$0xff]  }
  0x50   : > { %1402 = vmatprep.subr.bf16.mxu1 %v1566_v17  ;;  %v1583_v36 = vld [vmem:[%s1889_s26 + $0x8] sm:$0xff]   ;;  %v1586_v39 = vld [vmem:[%s1889_s26 + $0xc0] sm:$0xff]   ;;  %v1590_v43 = vld [vmem:[%s1889_s26 + $0x1f8] sm:$0xff]  }
  0x51   : > { %1552 = vset.pattern.permute.xlu1 %v1768_v15  ;;  %1553 = vset.pattern.permute.xlu0 %v1769_v16  ;;  %v1584_v37 = vld [vmem:[%s1889_s26 + $0x88] sm:$0xff]   ;;  %v1587_v40 = vld [vmem:[%s1889_s26] sm:$0xff]  }
  0x52   : > { %261 = vperm.xlu1 %1552, %v247_v1   ;;  %264 = vperm.xlu0 %1553, %v247_v1   ;;  %v1588_v41 = vld [vmem:[%s1889_s26 + $0x80] sm:$0xff]  }
  0x53   : > { %1381 = vmatpush3.bf16.msra.mxu0 %v1567_v18  ;;  %1403 = vmatpush3.bf16.msra.mxu1 %v1568_v19 }
  0x54   : > { %1382 = vmatprep.subr.bf16.mxu0 %v1569_v20  ;;  %1404 = vmatprep.subr.bf16.mxu1 %v1570_v21 }
  0x56   : > { %1554 = vset.pattern.permute.xlu1 %v1770_v22  ;;  %1556 = vset.pattern.permute.xlu0 %v1771_v24 }
  0x57   : > { %267 = vperm.xlu1 %1554, %v247_v1   ;;  %1383 = vmatpush3.bf16.msra.mxu0 %v1571_v23 }
  0x58   : > { %1405 = vmatpush3.bf16.msra.mxu1 %v1572_v25  ;;  %1384 = vmatprep.subr.bf16.mxu0 %v1573_v26 }
  0x59   : > { %1406 = vmatprep.subr.bf16.mxu1 %v1574_v27 }
  0x5b   : > { %1555 = vset.pattern.permute.xlu1 %v1771_v24  ;;  %1385 = vmatpush3.bf16.msra.mxu0 %v1575_v28 }
  0x5c   : > { %270 = vperm.xlu1 %1555, %v247_v1   ;;  %1407 = vmatpush3.bf16.msra.mxu1 %v1576_v29 }
  0x5d   : > { %1386 = vmatprep.subr.bf16.mxu0 %v1577_v30  ;;  %1408 = vmatprep.subr.bf16.mxu1 %v1578_v31 }
  0x5f   : > { %1387 = vmatpush3.bf16.msra.mxu0 %v1579_v32 }
  0x60   : > { %1409 = vmatpush3.bf16.msra.mxu1 %v1580_v33  ;;  %1388 = vmatprep.subr.bf16.mxu0 %v1581_v34 }
  0x61   : > { %1410 = vmatprep.subr.bf16.mxu1 %v1582_v35 }
  0x63   : > { %1389 = vmatpush3.bf16.msra.mxu0 %v1583_v36 }
  0x64   : > { %1411 = vmatpush3.bf16.msra.mxu1 %v1584_v37  ;;  %1390 = vmatprep.subr.bf16.mxu0 %v1585_v38 }
  0x65   : > { %1412 = vmatprep.subr.bf16.mxu1 %v1586_v39 }
  0x67   : > { %1391 = vmatpush3.bf16.msra.mxu0 %v1587_v40 }
  0x68   : > { %1413 = vmatpush3.bf16.msra.mxu1 %v1588_v41  ;;  %1420 = vmatprep.subr.bf16.mxu0 %v1589_v42 }
  0x69   : > { %1442 = vmatprep.subr.bf16.mxu1 %v1590_v43 }
  0xc3   : > { %v1938_v54 = vpop.permute.xlu1 %255  ;;  %v1940_v55 = vpop.permute.xlu0 %249 }
  0xc4   : > { %vm729_vm0 = vcmp.eq.s32.totalorder %v1940_v55, %v1936_v52  ;;  %vm280_vm1 = vcmp.eq.s32.totalorder %v1940_v55, %v1932_v50  ;;  %vm290_vm2 = vcmp.eq.s32.totalorder %v1938_v54, %v1932_v50  ;;  %vm505_vm3 = vcmp.eq.s32.totalorder %v1940_v55, %v1934_v51 }
  0xc5   : > { %vm515_vm4 = vcmp.eq.s32.totalorder %v1938_v54, %v1934_v51  ;;  %vm279_vm5 = vcmp.eq.s32.totalorder %v1940_v55, %v1942_v56  ;;  %vm289_vm6 = vcmp.eq.s32.totalorder %v1938_v54, %v1942_v56  ;;  %v1967_v61 = vsel %vm729_vm0, 1, %v1765_v4 }
  0xc6   : > { %v282_v0 = vsel %vm280_vm1, 1, %v1765_v4  ;;  %v292_v1 = vsel %vm290_vm2, 1, %v1765_v4  ;;  %v507_v2 = vsel %vm505_vm3, 1, %v1765_v4  ;;  %v517_v3 = vsel %vm515_vm4, 1, %v1765_v4 }
  0xc7   : > { %v281_v5 = vsel %vm279_vm5, 1, %v1765_v4  ;;  %v291_v8 = vsel %vm289_vm6, 1, %v1765_v4  ;;  %vm504_vm9 = vcmp.eq.s32.totalorder %v1940_v55, %v1952_v58  ;;  %vm514_vm13 = vcmp.eq.s32.totalorder %v1938_v54, %v1952_v58 }
  0xc8   : > { %v1969_v62 = vpop.permute.xlu1 %258  ;;  %v1971_v63 = vpop.permute.xlu0 %252  ;;  %v506_v32 = vsel %vm504_vm9, 1, %v1765_v4  ;;  %vm954_vm9 = vcmp.eq.s32.totalorder %v1940_v55, %v1950_v57  ;;  %v516_v44 = vsel %vm514_vm13, 1, %v1765_v4 }
  0xc9   : > { %vm284_vm7 = vcmp.eq.s32.totalorder %v1971_v63, %v1932_v50  ;;  %vm296_vm8 = vcmp.eq.s32.totalorder %v1969_v62, %v1932_v50  ;;  %vm509_vm10 = vcmp.eq.s32.totalorder %v1971_v63, %v1934_v51  ;;  %vm521_vm11 = vcmp.eq.s32.totalorder %v1969_v62, %v1934_v51 }
  0xca   : > { %v286_v6 = vsel %vm284_vm7, 1, %v1765_v4  ;;  %v298_v7 = vsel %vm296_vm8, 1, %v1765_v4  ;;  %vm283_vm12 = vcmp.eq.s32.totalorder %v1971_v63, %v1942_v56  ;;  %v511_v10 = vsel %vm509_vm10, 1, %v1765_v4 }
  0xcb   : > { %v288_v9 = vadd.s32 %v286_v6, %v282_v0  ;;  %v523_v11 = vsel %vm521_vm11, 1, %v1765_v4  ;;  %v285_v12 = vsel %vm283_vm12, 1, %v1765_v4  ;;  %vm295_vm14 = vcmp.eq.s32.totalorder %v1969_v62, %v1942_v56 }
  0xcc   : > { %v513_v16 = vadd.s32 %v511_v10, %v507_v2  ;;  %v287_v17 = vadd.s32 %v285_v12, %v281_v5  ;;  %v297_v18 = vsel %vm295_vm14, 1, %v1765_v4  ;;  %vm508_vm5 = vcmp.eq.s32.totalorder %v1971_v63, %v1952_v58 }
  0xcd   : > { %v2000_v13 = vpop.permute.xlu1 %261  ;;  %v2002_v14 = vpop.permute.xlu0 %264  ;;  %v294_v15 = vadd.s32 %v292_v1, %v288_v9  ;;  %v510_v41 = vsel %vm508_vm5, 1, %v1765_v4  ;;  %vm733_vm10 = vcmp.eq.s32.totalorder %v1971_v63, %v1936_v52  ;;  %vm520_vm11 = vcmp.eq.s32.totalorder %v1969_v62, %v1952_v58 }
  0xce   : > { %vm302_vm15 = vcmp.eq.s32.totalorder %v2000_v13, %v1932_v50  ;;  %vm308_vm0 = vcmp.eq.s32.totalorder %v2002_v14, %v1932_v50  ;;  %vm527_vm1 = vcmp.eq.s32.totalorder %v2000_v13, %v1934_v51  ;;  %vm533_vm2 = vcmp.eq.s32.totalorder %v2002_v14, %v1934_v51 }
  0xcf   : > { %v300_v19 = vadd.s32 %v298_v7, %v294_v15  ;;  %v304_v20 = vsel %vm302_vm15, 1, %v1765_v4  ;;  %v310_v21 = vsel %vm308_vm0, 1, %v1765_v4  ;;  %v519_v22 = vadd.s32 %v517_v3, %v513_v16  ;;  %v1591_v16 = vld [vmem:[%s1889_s26 + $0x138] sm:$0xff]  }
  0xd0   : > { %v529_v23 = vsel %vm527_vm1, 1, %v1765_v4  ;;  %v535_v24 = vsel %vm533_vm2, 1, %v1765_v4  ;;  %v293_v25 = vadd.s32 %v291_v8, %v287_v17  ;;  %vm301_vm3 = vcmp.eq.s32.totalorder %v2000_v13, %v1942_v56 }
  0xd1   : > { %v306_v26 = vadd.s32 %v304_v20, %v300_v19  ;;  %v525_v27 = vadd.s32 %v523_v11, %v519_v22  ;;  %v303_v28 = vsel %vm301_vm3, 1, %v1765_v4  ;;  %vm307_vm4 = vcmp.eq.s32.totalorder %v2002_v14, %v1942_v56  ;;  %v1593_v20 = vld [vmem:[%s1889_s26 + $0x170] sm:$0xff]  }
  0xd2   : > { %v2022_v29 = vpop.permute.xlu1 %267  ;;  %v299_v30 = vadd.s32 %v297_v18, %v293_v25  ;;  %v309_v31 = vsel %vm307_vm4, 1, %v1765_v4  ;;  %v512_v43 = vadd.s32 %v510_v41, %v506_v32  ;;  %v522_v47 = vsel %vm520_vm11, 1, %v1765_v4  ;;  %v1599_v41 = vld [vmem:[%s1889_s26 + $0x128] sm:$0xff]  }
  0xd3   : > { %v312_v33 = vadd.s32 %v310_v21, %v306_v26  ;;  %vm314_vm6 = vcmp.eq.s32.totalorder %v2022_v29, %v1932_v50  ;;  %v531_v34 = vadd.s32 %v529_v23, %v525_v27  ;;  %vm539_vm7 = vcmp.eq.s32.totalorder %v2022_v29, %v1934_v51 }
  0xd4   : > { %v316_v35 = vsel %vm314_vm6, 1, %v1765_v4  ;;  %v541_v36 = vsel %vm539_vm7, 1, %v1765_v4  ;;  %v305_v37 = vadd.s32 %v303_v28, %v299_v30  ;;  %vm313_vm8 = vcmp.eq.s32.totalorder %v2022_v29, %v1942_v56 }
  0xd5   : > { %v318_v38 = vadd.s32 %v316_v35, %v312_v33  ;;  %v537_v39 = vadd.s32 %v535_v24, %v531_v34  ;;  %v315_v40 = vsel %vm313_vm8, 1, %v1765_v4  ;;  %vm526_vm12 = vcmp.eq.s32.totalorder %v2000_v13, %v1952_v58  ;;  %v1597_v33 = vld [vmem:[%s1889_s26 + $0x168] sm:$0xff]  }
  0xd6   : > { %v311_v42 = vadd.s32 %v309_v31, %v305_v37  ;;  %vm532_vm14 = vcmp.eq.s32.totalorder %v2002_v14, %v1952_v58  ;;  %v518_v1 = vadd.s32 %v516_v44, %v512_v43  ;;  %v528_v6 = vsel %vm526_vm12, 1, %v1765_v4  ;;  %v1595_v31 = vld [vmem:[%s1889_s26 + $0x130] sm:$0xff]  }
  0xd7   : > { %v2051_v45 = vpop.permute.xlu1 %270  ;;  %v543_v46 = vadd.s32 %v541_v36, %v537_v39  ;;  %vm958_vm1 = vcmp.eq.s32.totalorder %v1971_v63, %v1950_v57  ;;  %vm538_vm2 = vcmp.eq.s32.totalorder %v2022_v29, %v1952_v58  ;;  %vm730_vm4 = vcmp.eq.s32.totalorder %v1940_v55, %v1962_v59 }
  0xd8   : > { %vm320_vm15 = vcmp.eq.s32.totalorder %v2051_v45, %v1932_v50  ;;  %vm545_vm13 = vcmp.eq.s32.totalorder %v2051_v45, %v1934_v51  ;;  %v317_v48 = vadd.s32 %v315_v40, %v311_v42  ;;  %vm319_vm0 = vcmp.eq.s32.totalorder %v2051_v45, %v1942_v56 }
  0xd9   : > { %v322_v49 = vsel %vm320_vm15, 1, %v1765_v4  ;;  %v547_v53 = vsel %vm545_vm13, 1, %v1765_v4  ;;  %v321_v0 = vsel %vm319_vm0, 1, %v1765_v4  ;;  %v524_v50 = vadd.s32 %v522_v47, %v518_v1  ;;  %v1601_v47 = vld [vmem:[%s1889_s26 + $0x160] sm:$0xff]  }
  0xda   : > { %v324_v2 = vadd.s32 %v322_v49, %v318_v38  ;;  %v549_v3 = vadd.s32 %v547_v53, %v543_v46  ;;  %v323_v5 = vadd.s32 %v321_v0, %v317_v48  ;;  %v534_v51 = vsel %vm532_vm14, 1, %v1765_v4  ;;  %v1594_v46 = vld [vmem:[%s1889_s26 + $0x1f0] sm:$0xff]  }
  0xdb   : > { %vm544_vm3 = vcmp.eq.s32.totalorder %v2051_v45, %v1952_v58  ;;  %v530_v9 = vadd.s32 %v528_v6, %v524_v50  ;;  %v540_v10 = vsel %vm538_vm2, 1, %v1765_v4  ;;  %vm734_vm5 = vcmp.eq.s32.totalorder %v1971_v63, %v1962_v59  ;;  %v1596_v6 = vld [vmem:[%s1889_s26 + $0x1b0] sm:$0xff]   ;;  %v1603_v50 = vld [vmem:[%s1889_s26 + $0x120] sm:$0xff]  }
  0xdc   : > { %v359_v56 = vcvt.s32.f32 %v324_v2  ;;  %v584_v7 = vcvt.s32.f32 %v549_v3  ;;  %v358_v8 = vcvt.s32.f32 %v323_v5  ;;  %vm739_vm6 = vcmp.eq.s32.totalorder %v1938_v54, %v1936_v52 }
  0xdd   : > { %v732_v17 = vsel %vm730_vm4, 1, %v1765_v4  ;;  %v536_v18 = vadd.s32 %v534_v51, %v530_v9  ;;  %v736_v19 = vsel %vm734_vm5, 1, %v1765_v4  ;;  %vm740_vm7 = vcmp.eq.s32.totalorder %v1938_v54, %v1962_v59 }
  0xde   : > { %v361_v11 = vpack.c.bf16 %v359_v56, %v359_v56  ;;  %v586_v12 = vpack.c.bf16 %v584_v7, %v584_v7  ;;  %v360_v15 = vpack.c.bf16 %v358_v8, %v358_v8  ;;  %vm746_vm8 = vcmp.eq.s32.totalorder %v1969_v62, %v1962_v59  ;;  %v1598_v56 = vld [vmem:[%s1889_s26 + $0x1e8] sm:$0xff]   ;;  %v1605_v7 = vld [vmem:[%s1889_s26 + $0x158] sm:$0xff]  }
  0xdf   : > { %v2094_v21 = vsel %vm954_vm9, 1, %v1765_v4  ;;  %v546_v22 = vsel %vm544_vm3, 1, %v1765_v4  ;;  %v738_v23 = vadd.s32 %v736_v19, %v732_v17  ;;  %vm752_vm11 = vcmp.eq.s32.totalorder %v2000_v13, %v1962_v59  ;;  %v1600_v19 = vld [vmem:[%s1889_s26 + $0x1a8] sm:$0xff]  }
  0xe0   : > { %490 = vmatprep.mubr.bf16.mxu0 %v361_v11  ;;  %715 = vmatprep.mubr.bf16.mxu1 %v586_v12  ;;  %v735_v24 = vsel %vm733_vm10, 1, %v1765_v4  ;;  %v2110_v25 = vsel %vm958_vm1, 1, %v1765_v4  ;;  %v542_v26 = vadd.s32 %v540_v10, %v536_v18  ;;  %v742_v58 = vsel %vm740_vm7, 1, %v1765_v4 }
  0xe1   : > { %491 = vmatmul.mubr.bf16.vlgmr.msra.gmra.mxu0 %v360_v15  ;;  %v744_v27 = vadd.s32 %v742_v58, %v738_v23  ;;  %v748_v28 = vsel %vm746_vm8, 1, %v1765_v4  ;;  %v754_v30 = vsel %vm752_vm11, 1, %v1765_v4  ;;  %vm758_vm9 = vcmp.eq.s32.totalorder %v2002_v14, %v1962_v59  ;;  %v1602_v23 = vld [vmem:[%s1889_s26 + $0x1e0] sm:$0xff]  }
  0xe2   : > { %1421 = vmatpush3.bf16.msra.mxu0 %v1591_v16  ;;  %vm964_vm10 = vcmp.eq.s32.totalorder %v1938_v54, %v1950_v57  ;;  %v548_v32 = vadd.s32 %v546_v22, %v542_v26  ;;  %vm764_vm12 = vcmp.eq.s32.totalorder %v2022_v29, %v1962_v59  ;;  %vm955_vm14 = vcmp.eq.s32.totalorder %v1940_v55, %v1964_v60  ;;  %v1609_v26 = vld [vmem:[%s1889_s26 + $0x150] sm:$0xff]  }
  0xe3   : > { %vm959_vm15 = vcmp.eq.s32.totalorder %v1971_v63, %v1964_v60  ;;  %1422 = vmatprep.subr.bf16.mxu0 %v1593_v20  ;;  %v750_v34 = vadd.s32 %v748_v28, %v744_v27  ;;  %v957_v35 = vsel %vm955_vm14, 1, %v1765_v4  ;;  %vm965_vm13 = vcmp.eq.s32.totalorder %v1938_v54, %v1964_v60  ;;  %v1592_v63 = vld [vmem:[%s1889_s26 + $0x1b8] sm:$0xff]  }
  0xe4   : > { %v961_v36 = vsel %vm959_vm15, 1, %v1765_v4  ;;  %v583_v37 = vcvt.s32.f32 %v548_v32  ;;  %v760_v38 = vsel %vm758_vm9, 1, %v1765_v4  ;;  %vm971_vm0 = vcmp.eq.s32.totalorder %v1969_v62, %v1964_v60  ;;  %v1606_v32 = vld [vmem:[%s1889_s26 + $0x1d8] sm:$0xff]  }
  0xe5   : > { %v963_v55 = vadd.s32 %v961_v36, %v957_v35  ;;  %v756_v39 = vadd.s32 %v754_v30, %v750_v34  ;;  %vm770_vm1 = vcmp.eq.s32.totalorder %v2051_v45, %v1962_v59  ;;  %v967_v40 = vsel %vm965_vm13, 1, %v1765_v4  ;;  %v1613_v36 = vld [vmem:[%s1889_s26 + $0x148] sm:$0xff]  }
  0xe6   : > { %vm977_vm2 = vcmp.eq.s32.totalorder %v2000_v13, %v1964_v60  ;;  %1423 = vmatpush3.bf16.msra.mxu0 %v1595_v31  ;;  %v585_v42 = vpack.c.bf16 %v583_v37, %v583_v37  ;;  %v766_v43 = vsel %vm764_vm12, 1, %v1765_v4  ;;  %vm983_vm3 = vcmp.eq.s32.totalorder %v2002_v14, %v1964_v60 }
  0xe7   : > { %v969_v44 = vadd.s32 %v967_v40, %v963_v55  ;;  %1424 = vmatprep.subr.bf16.mxu0 %v1597_v33  ;;  %v762_v48 = vadd.s32 %v760_v38, %v756_v39  ;;  %v973_v49 = vsel %vm971_vm0, 1, %v1765_v4  ;;  %v979_v53 = vsel %vm977_vm2, 1, %v1765_v4  ;;  %v1608_v38 = vld [vmem:[%s1889_s26 + $0x198] sm:$0xff]   ;;  %v1615_v39 = vld [vmem:[%s1889_s26 + $0x108] sm:$0xff]   ;;  %v1617_v40 = vld [vmem:[%s1889_s26 + $0x140] sm:$0xff]  }
  0xe8   : > { %v737_v0 = vadd.s32 %v735_v24, %v1967_v61  ;;  %716 = vmatmul.mubr.bf16.vlgmr.msra.gmra.mxu1 %v585_v42  ;;  %v772_v1 = vsel %vm770_vm1, 1, %v1765_v4  ;;  %vm989_vm4 = vcmp.eq.s32.totalorder %v2022_v29, %v1964_v60  ;;  %v741_v3 = vsel %vm739_vm6, 1, %v1765_v4  ;;  %v1607_v24 = vld [vmem:[%s1889_s26 + $0x118] sm:$0xff]  }
  0xe9   : > { %v975_v2 = vadd.s32 %v973_v49, %v969_v44  ;;  %1443 = vmatpush3.bf16.msra.mxu1 %v1592_v63  ;;  %v768_v5 = vadd.s32 %v766_v43, %v762_v48  ;;  %v985_v61 = vsel %vm983_vm3, 1, %v1765_v4  ;;  %vm745_vm5 = vcmp.eq.s32.totalorder %v1969_v62, %v1936_v52  ;;  %v1612_v43 = vld [vmem:[%s1889_s26 + $0x190] sm:$0xff]  }
  0xea   : > { %1425 = vmatpush3.bf16.msra.mxu0 %v1599_v41  ;;  %v743_v59 = vadd.s32 %v741_v3, %v737_v0  ;;  %vm995_vm7 = vcmp.eq.s32.totalorder %v2051_v45, %v1964_v60  ;;  %1444 = vmatprep.subr.bf16.mxu1 %v1594_v46  ;;  %v747_v8 = vsel %vm745_vm5, 1, %v1765_v4  ;;  %vm751_vm6 = vcmp.eq.s32.totalorder %v2000_v13, %v1936_v52  ;;  %v1614_v46 = vld [vmem:[%s1889_s26 + $0x1c8] sm:$0xff]   ;;  %v1618_v0 = vld [vmem:[%s1889_s26 + $0x1c0] sm:$0xff]  }
  0xeb   : > { %v981_v51 = vadd.s32 %v979_v53, %v975_v2  ;;  %1426 = vmatprep.subr.bf16.mxu0 %v1601_v47  ;;  %v774_v9 = vadd.s32 %v772_v1, %v768_v5  ;;  %v991_v10 = vsel %vm989_vm4, 1, %v1765_v4  ;;  %v753_v12 = vsel %vm751_vm6, 1, %v1765_v4  ;;  %v1616_v53 = vld [vmem:[%s1889_s26 + $0x188] sm:$0xff]  }
  0xec   : > { %v749_v11 = vadd.s32 %v747_v8, %v743_v59  ;;  %vm757_vm8 = vcmp.eq.s32.totalorder %v2002_v14, %v1936_v52  ;;  %v962_v16 = vadd.s32 %v2110_v25, %v2094_v21  ;;  %v997_v18 = vsel %vm995_vm7, 1, %v1765_v4  ;;  %v357_v8 = vld [vmem:[#allocation2] sm:$0xff] }
  0xed   : > { %v987_v15 = vadd.s32 %v985_v61, %v981_v51  ;;  %v809_v17 = vcvt.s32.f32 %v774_v9  ;;  %1445 = vmatpush3.bf16.msra.mxu1 %v1596_v6  ;;  %v966_v20 = vsel %vm964_vm10, 1, %v1765_v4  ;;  %vm970_vm11 = vcmp.eq.s32.totalorder %v1969_v62, %v1950_v57  ;;  %v1604_v62 = vld [vmem:[%s1889_s26 + $0x1a0] sm:$0xff]  }
  0xee   : > { %1427 = vmatpush3.bf16.msra.mxu0 %v1603_v50  ;;  %v755_v60 = vadd.s32 %v753_v12, %v749_v11  ;;  %1446 = vmatprep.subr.bf16.mxu1 %v1598_v56  ;;  %v968_v21 = vadd.s32 %v966_v20, %v962_v16  ;;  %v759_v58 = vsel %vm757_vm8, 1, %v1765_v4  ;;  %v972_v54 = vsel %vm970_vm11, 1, %v1765_v4 }
  0xef   : > { %v993_v22 = vadd.s32 %v991_v10, %v987_v15  ;;  %1428 = vmatprep.subr.bf16.mxu0 %v1605_v7  ;;  %v811_v25 = vpack.c.bf16 %v809_v17, %v809_v17  ;;  %vm976_vm9 = vcmp.eq.s32.totalorder %v2000_v13, %v1950_v57  ;;  %vm763_vm10 = vcmp.eq.s32.totalorder %v2022_v29, %v1936_v52  ;;  %v1611_v13 = vld [vmem:[%s1889_s26 + $0x110] sm:$0xff]  }
  0xf0   : > { %v974_v28 = vadd.s32 %v972_v54, %v968_v21  ;;  %v978_v30 = vsel %vm976_vm9, 1, %v1765_v4  ;;  %v761_v33 = vadd.s32 %v759_v58, %v755_v60  ;;  %vm769_vm12 = vcmp.eq.s32.totalorder %v2051_v45, %v1936_v52  ;;  %v1610_v52 = vld [vmem:[%s1889_s26 + $0x1d0] sm:$0xff]  }
  0xf1   : > { %v999_v27 = vadd.s32 %v997_v18, %v993_v22  ;;  %940 = vmatprep.mubr.bf16.mxu0 %v811_v25  ;;  %1447 = vmatpush3.bf16.msra.mxu1 %v1600_v19  ;;  %vm982_vm14 = vcmp.eq.s32.totalorder %v2002_v14, %v1950_v57  ;;  %v765_v34 = vsel %vm763_vm10, 1, %v1765_v4  ;;  %v771_v55 = vsel %vm769_vm12, 1, %v1765_v4 }
  0xf2   : > { %1448 = vmatprep.subr.bf16.mxu1 %v1602_v23  ;;  %1429 = vmatpush3.bf16.msra.mxu0 %v1607_v24  ;;  %v980_v37 = vadd.s32 %v978_v30, %v974_v28  ;;  %v984_v63 = vsel %vm982_vm14, 1, %v1765_v4  ;;  %v767_v14 = vadd.s32 %v765_v34, %v761_v33  ;;  %vm988_vm15 = vcmp.eq.s32.totalorder %v2022_v29, %v1950_v57  ;;  %v1619_v29 = vld [vmem:[%s1889_s26 + $0x100] sm:$0xff]  }
  0xf3   : > { %v1034_v31 = vcvt.s32.f32 %v999_v27  ;;  %1430 = vmatprep.subr.bf16.mxu0 %v1609_v26  ;;  %vm994_vm13 = vcmp.eq.s32.totalorder %v2051_v45, %v1950_v57  ;;  %v990_v44 = vsel %vm988_vm15, 1, %v1765_v4  ;;  %v1620_v45 = vld [vmem:[%s1889_s26 + $0x180] sm:$0xff]  }
  0xf4   : > { %v773_v41 = vadd.s32 %v771_v55, %v767_v14  ;;  %v986_v42 = vadd.s32 %v984_v63, %v980_v37  ;;  %v996_v47 = vsel %vm994_vm13, 1, %v1765_v4 }
  0xf5   : > { %v1036_v35 = vpack.c.bf16 %v1034_v31, %v1034_v31  ;;  %1449 = vmatpush3.bf16.msra.mxu1 %v1604_v62 }
  0xf6   : > { %1450 = vmatprep.subr.bf16.mxu1 %v1606_v32  ;;  %1431 = vmatpush3.bf16.msra.mxu0 %v1611_v13  ;;  %v808_v48 = vcvt.s32.f32 %v773_v41  ;;  %v992_v49 = vadd.s32 %v990_v44, %v986_v42 }
  0xf7   : > { %1165 = vmatprep.mubr.bf16.mxu1 %v1036_v35  ;;  %1432 = vmatprep.subr.bf16.mxu0 %v1613_v36 }
  0xf8   : > { %v998_v1 = vadd.s32 %v996_v47, %v992_v49  ;;  %v810_v57 = vpack.c.bf16 %v808_v48, %v808_v48 }
  0xf9   : > { %1451 = vmatpush3.bf16.msra.mxu1 %v1608_v38 }
  0xfa   : > { %1452 = vmatprep.subr.bf16.mxu1 %v1610_v52  ;;  %1433 = vmatpush3.bf16.msra.mxu0 %v1615_v39  ;;  %v1033_v2 = vcvt.s32.f32 %v998_v1 }
  0xfb   : > { %1434 = vmatprep.subr.bf16.mxu0 %v1617_v40 }
  0xfc   : > { %v1035_v3 = vpack.c.bf16 %v1033_v2, %v1033_v2 }
  0xfd   : > { %1453 = vmatpush3.bf16.msra.mxu1 %v1612_v43 }
  0xfe   : > { %1454 = vmatprep.subr.bf16.mxu1 %v1614_v46  ;;  %1435 = vmatpush3.bf16.msra.mxu0 %v1619_v29 }
 0x101   : > { %1455 = vmatpush3.bf16.msra.mxu1 %v1616_v53  ;;  %941 = vmatmul.mubr.bf16.vlgmr.msra.gmra.mxu0 %v810_v57 }
 0x102   : > { %1456 = vmatprep.subr.bf16.mxu1 %v1618_v0 }
 0x105   : > { %1457 = vmatpush3.bf16.msra.mxu1 %v1620_v45 }
 0x108   : > { %1166 = vmatmul.mubr.bf16.vlgmr.msra.gmra.mxu1 %v1035_v3 }
 0x1a1   : > { %v1392_v5 = vpop.f32.mrf.mxu0 }
 0x1a3   : > { %v1393_v4 = vpop.f32.mrf.mxu0 }
 0x1a4   : > { %v1394_v7 = vadd.f32 %v1393_v4, %v1392_v5 }
 0x1a5   : > { %v1395_v61 = vpop.f32.mrf.mxu0 }
 0x1a6   : > { %v498_v10 = vadd.f32 %v1394_v7, %v357_v8 }
 0x1a7   : > { %v1396_v6 = vpop.f32.mrf.mxu0 }
 0x1a8   : > { %v1414_v50 = vpop.f32.mrf.mxu1 }
 0x1aa   : > { %v1415_v59 = vpop.f32.mrf.mxu1 }
 0x1ab   : > { %v1416_v12 = vadd.f32 %v1415_v59, %v1414_v50 }
 0x1ac   : > { %v1417_v51 = vpop.f32.mrf.mxu1 }
 0x1ad   : > { %v723_v17 = vadd.f32 %v1416_v12, %v498_v10 }
 0x1ae   : > { %v1418_v56 = vpop.f32.mrf.mxu1 }
 0x1c1   : > { %v1436_v9 = vpop.f32.mrf.mxu0 }
 0x1c3   : > { %v1437_v11 = vpop.f32.mrf.mxu0 }
 0x1c4   : > { %v1438_v15 = vadd.f32 %v1437_v11, %v1436_v9 }
 0x1c5   : > { %v1439_v16 = vpop.f32.mrf.mxu0 }
 0x1c6   : > { %v948_v60 = vadd.f32 %v1438_v15, %v723_v17 }
 0x1c7   : > { %v1440_v19 = vpop.f32.mrf.mxu0 }
 0x1c8   : > { %v1458_v18 = vpop.f32.mrf.mxu1 }
 0x1ca   : > { %v1459_v20 = vpop.f32.mrf.mxu1 }
 0x1cb   : > { %v1460_v22 = vadd.f32 %v1459_v20, %v1458_v18  ;;  %1178 = sbr.rel (%p1369_p3) target bundleno = 474 (0x1da), region = 48 }
 0x1cc   : > { %v1461_v23 = vpop.f32.mrf.mxu1 }
 0x1cd   : > { %v1173_v24 = vadd.f32 %v1460_v22, %v948_v60 }
 0x1ce   : > { %v1462_v21 = vpop.f32.mrf.mxu1 }
 0x1cf   : > { %1174 = vst [vmem:[#allocation2] sm:$0xff] %v1173_v24 }
 0x1d0   : > { %v1370_v26 = vld [vmem:[%s2275_s2] ss:$0 sm:$0xff] }
 0x1d6   : > { %v1179_v25 = vld [vmem:[#allocation2] sm:$0xff] }
 0x1d7   : > { %v1187_v58 = vadd.f32 %v1370_v26, %v1179_v25 }
 0x1d9   : > { %1188 = vst [vmem:[#allocation8] sm:$0xff] %v1187_v58 }
 0x1da PF: > { %p2240_p4 = scmp.eq.s32.totalorder %s1292_s18, 1  ;;  %s1772_s12 = smov [#allocation8]  }
 0x1db   : > { %s1199_s23 = sshll.u32 %s1772_s12, 4  ;;  %s1200_s23 = int_to_ptr.vmem [resolvable:$true] %s1199_s23 }
 0x1dc   : > { %s1675_s15 = scalar_lea.vmem %s1200_s23, 128  ;;  %p1682_p10 = scmp.lt.s32.totalorder %s1200_s23, %s1200_s23 }
 0x1dd   : > { %p1676_p6 = scmp.ne.s32.totalorder %s1200_s23, %s1675_s15  ;;  %p1683_p11 = scmp.lt.s32.totalorder %s1675_s15, %s1675_s15 }
 0x1df   : > { %p1677_p8 = pnand %p1676_p6, %p2240_p4  ;;  %p1684_p13 = por %p1683_p11, %p1682_p10 }
 0x1e1   : > { %p1678_p9 = pneg %p1677_p8 }
 0x1e3   : > { %p1685_p0 = pnand %p1684_p13, %p1678_p9 }
 0x1e5   : > { %1688 = shalt.err (!%p1685_p0)
}
 0x1e6   : > { %1471 = dma.vmem_to_hbm [thread:$0]  (%p2240_p4), %s1200_s23, 128, %s2276_s3, [#allocation5]  }
 0x1e7   : > { %1732 = dma.done.wait (%p2240_p4), [#allocation5], 128  }
 0x1e8   : > { %1734 = vsyncadd (%p2240_p4), [#allocation5], 4294967168 }
 0x1e9 PF: > { %s18_s17 = sadd.s32 1, %s1757_s17   ;;  %s2287_s12 = smov %s1741_s13 }
 0x1ea   : > { %p15_p1 = scmp.ge.s32.totalorder %s18_s17, 4   ;;  %s2288_s13 = smov %s1745_s14 }
 0x1eb   : > { %s2289_s14 = smov %s1880_s5  ;;  %s2290_s15 = smov %s1753_s16 }
 0x1ec   : > { %s2291_s16 = smov %s2293_s30  ;;  %17 = sbr.rel (!%p15_p1) target bundleno = 6 (0x6), region = 87 }
 0x1f1   :  { %1212 = vsyncpa [#allocation4], 1 }
 0x1f2   :  { %1214 = vsyncpa [#allocation4 + $0x1], 1 }
 0x1f3   :  { %1215 = vsyncpa [#allocation7], 1 }
 0x1f4   :  { %1217 = vsyncpa [#allocation7 + $0x1], 1 }
 0x1f5   :  { %1218 = vsyncpa [#allocation5], 1 }
 0x1f6   :  { %1220 = vsyncpa [#allocation5 + $0x1], 1 }

</bundles_post_ra>
